<compile_context>
chip_gen: v7x
topology: tpu7x:2x2x1
jax: 0.10.0
libtpu: 0.0.40
codegen_flags: <defaults>
</compile_context>

<pallas_src>
import functools

import numpy as np
import jax
import jax.numpy as jnp
from jax.experimental import pallas as pl
from jax.experimental.pallas import tpu as pltpu

HIDDEN = 32
OUT_CH = 3


# ---------------------------------------------------------------------------
# Fused kernel: transform + MLP + color affine (+ optional bilinear resize)
# ---------------------------------------------------------------------------
def _make_inr_kernel(do_resize):
    def kernel(aff_ref, coords_ref, wpT_ref, w1T_ref, b1c_ref,
               w2cT_ref, b2c_ref, *rest):
        if do_resize:
            rT_ref, out_ref = rest
        else:
            (out_ref,) = rest

        b = pl.program_id(0)
        cth = aff_ref[b, 0]          # cos(theta)
        sth = aff_ref[b, 1]          # sin(theta)
        dx = aff_ref[b, 2]
        dy = aff_ref[b, 3]

        x_row = coords_ref[0, 0:1, :]            # (1, HW)  pixels on lanes
        y_row = coords_ref[0, 1:2, :]            # (1, HW)

        # Per-sample affine coordinate transform (VPU broadcast FMAs).
        tx = x_row * cth - y_row * sth + dx      # (1, HW)
        ty = x_row * sth + y_row * cth + dy      # (1, HW)

        # Input projection Linear(2 -> hid), feature-major (bias folded into b1c).
        h0 = wpT_ref[:, 0:1] * tx + wpT_ref[:, 1:2] * ty          # (hid, HW)

        # Decoder layer 1 + ReLU (MXU).
        h1 = jnp.maximum(
            jnp.dot(w1T_ref[...], h0, preferred_element_type=jnp.float32)
            + b1c_ref[...],
            0.0)                                                   # (hid, HW)

        # Decoder layer 2 with per-sample color scale/bias folded into W2/b2 (MXU).
        y = (jnp.dot(w2cT_ref[0], h1, preferred_element_type=jnp.float32)
             + b2c_ref[0])                                         # (OUT_CH, HW)

        if do_resize:
            # Fused bilinear resize: (OUT_CH, HW) @ (HW, Hout*Wout), lane-dense store.
            out_ref[0] = jnp.dot(y, rT_ref[...],
                                 preferred_element_type=jnp.float32)
        else:
            out_ref[0] = y

    return kernel


# ---------------------------------------------------------------------------
# Host-side helpers
# ---------------------------------------------------------------------------
def bilinear_matrix(in_size, out_size):
    """Interpolation matrix matching torch F.interpolate(mode='bilinear',
    align_corners=False) along one axis.  Shape: (out_size, in_size), np.float32."""
    scale = in_size / out_size
    dst = np.arange(out_size, dtype=np.float64)
    src = (dst + 0.5) * scale - 0.5
    src = np.clip(src, 0.0, None)
    i0 = np.minimum(np.floor(src).astype(np.int64), in_size - 1)
    i1 = np.minimum(i0 + 1, in_size - 1)
    w1 = np.clip(src - i0, 0.0, 1.0)
    w0 = 1.0 - w1
    R = np.zeros((out_size, in_size), np.float32)
    R[np.arange(out_size), i0] += w0.astype(np.float32)
    R[np.arange(out_size), i1] += w1.astype(np.float32)
    return R


@functools.lru_cache(maxsize=None)
def fused_resize_operator(H, W, Hout, Wout):
    """Separable bilinear resize folded into one (HW, Hout*Wout) operator:
    out_flat = img_flat @ kron(Ry, Rx)^T."""
    ry = bilinear_matrix(H, Hout)                    # (Hout, H)
    rx = bilinear_matrix(W, Wout)                    # (Wout, W)
    return np.ascontiguousarray(np.kron(ry, rx).T)   # (H*W, Hout*Wout)


def init_params(key, num_samples, hidden=HIDDEN):
    ks = jax.random.split(key, 8)
    p = {}
    # NOTE: the PyTorch module initializes shifts/angles to zero and the color
    # transforms to identity; small nonzero values are used here so the
    # transform code paths are numerically exercised.
    p["shift"] = 0.05 * jax.random.normal(ks[0], (num_samples, 2), jnp.float32)
    p["angle"] = 0.05 * jax.random.normal(ks[1], (num_samples, 1), jnp.float32)
    p["color_w"] = 1.0 + 0.1 * jax.random.normal(ks[2], (num_samples, OUT_CH), jnp.float32)
    p["color_b"] = 0.05 * jax.random.normal(ks[3], (num_samples, OUT_CH), jnp.float32)
    p["wp"] = jax.random.normal(ks[4], (2, hidden), jnp.float32) / jnp.sqrt(2.0)
    p["bp"] = jnp.zeros((1, hidden), jnp.float32)
    p["w1"] = jax.random.normal(ks[5], (hidden, hidden), jnp.float32) / jnp.sqrt(hidden)
    p["b1"] = jnp.zeros((1, hidden), jnp.float32)
    p["w2"] = jax.random.normal(ks[6], (hidden, OUT_CH), jnp.float32) / jnp.sqrt(hidden)
    p["b2"] = jnp.zeros((1, OUT_CH), jnp.float32)
    return p


@functools.partial(jax.jit, static_argnames=("scale_factor", "training"))
def inr_forward(x, sample_idx, params, scale_factor=2.0, training=True):
    """x: [B, H, W, 2] coordinate grid (NHWC-style, last dim = (x, y) coords)."""
    B, H, W, C = x.shape
    assert C == 2
    HW = H * W
    hid = params["wp"].shape[1]

    # --- per-sample affine transform scalars (theta = [[cos,-sin,dx],[sin,cos,dy]]) ---
    shift = params["shift"][sample_idx]                 # (B, 2)
    angle = params["angle"][sample_idx][:, 0]           # (B,)
    dx, dy = shift[:, 0], shift[:, 1]
    c, s = jnp.cos(angle), jnp.sin(angle)
    aff = jnp.stack([c, s, dx, dy], axis=-1).astype(jnp.float32)   # (B, 4) -> SMEM prefetch

    # --- per-sample color affine, folded into the decoder output layer ---
    cw = params["color_w"][sample_idx]                  # (B, 3)
    cb = params["color_b"][sample_idx]
    skip = (sample_idx == 0)[:, None]                   # sample 0: identity color transform
    cw = jnp.where(skip, 1.0, cw)
    cb = jnp.where(skip, 0.0, cb)
    w2cT = params["w2"].T[None, :, :] * cw[:, :, None]              # (B, 3, hid)
    b2c = (params["b2"][0][None, :] * cw + cb)[:, :, None]          # (B, 3, 1)

    # --- fold input-projection bias through the (linear) first decoder layer ---
    b1c = (params["bp"] @ params["w1"] + params["b1"]).reshape(hid, 1)   # (hid, 1)
    wpT = params["wp"].T.astype(jnp.float32)            # (hid, 2)
    w1T = params["w1"].T.astype(jnp.float32)            # (hid, hid)

    # Feature-major coordinates: pixels ride the 128-lane axis.
    coords_T = x.reshape(B, HW, C).transpose(0, 2, 1).astype(jnp.float32)   # (B, 2, HW)

    if training:
        Hout, Wout = int(H * scale_factor), int(W * scale_factor)
        HWo = Hout * Wout
        rT = jnp.asarray(fused_resize_operator(H, W, Hout, Wout))   # (HW, HWo)
        extra_in = [rT]
        extra_specs = [pl.BlockSpec((HW, HWo), lambda b, aff: (0, 0))]
        out_lanes = HWo
    else:
        extra_in, extra_specs, out_lanes = [], [], HW

    out_flat = pl.pallas_call(
        _make_inr_kernel(training),
        out_shape=jax.ShapeDtypeStruct((B, OUT_CH, out_lanes), jnp.float32),
        grid_spec=pltpu.PrefetchScalarGridSpec(
            num_scalar_prefetch=1,                      # aff -> SMEM
            grid=(B,),
            in_specs=[
                pl.BlockSpec((1, 2, HW), lambda b, aff: (b, 0, 0)),        # coords (per-sample)
                pl.BlockSpec((hid, 2), lambda b, aff: (0, 0)),             # wp^T   (resident)
                pl.BlockSpec((hid, hid), lambda b, aff: (0, 0)),           # w1^T   (resident)
                pl.BlockSpec((hid, 1), lambda b, aff: (0, 0)),             # b1_eff (resident)
                pl.BlockSpec((1, OUT_CH, hid), lambda b, aff: (b, 0, 0)),  # w2^T * color_w
                pl.BlockSpec((1, OUT_CH, 1), lambda b, aff: (b, 0, 0)),    # b2*cw + cb
            ] + extra_specs,                                               # resize operator
            out_specs=pl.BlockSpec((1, OUT_CH, out_lanes),
                                   lambda b, aff: (b, 0, 0)),
        ),
        compiler_params=pltpu.CompilerParams(
            dimension_semantics=("parallel",)),
    )(aff, coords_T, wpT, w1T, b1c, w2cT, b2c, *extra_in)

    shifts = (dx, dy)

    if training:
        Hout, Wout = int(H * scale_factor), int(W * scale_factor)
        out = out_flat.reshape(B, OUT_CH, Hout, Wout).transpose(0, 2, 3, 1)   # NHWC
    else:
        out = out_flat.reshape(B, OUT_CH, H, W).transpose(0, 2, 3, 1)
    return out, shifts


# ---------------------------------------------------------------------------
# Pure-JAX reference (for correctness check only)
# ---------------------------------------------------------------------------
def reference_forward(x, sample_idx, params, scale_factor):
    B, H, W, C = x.shape
    shift = params["shift"][sample_idx]
    angle = params["angle"][sample_idx][:, 0]
    dx, dy = shift[:, 0], shift[:, 1]
    c, s = jnp.cos(angle), jnp.sin(angle)
    rot_T = jnp.stack([jnp.stack([c, s], -1), jnp.stack([-s, c], -1)], axis=1)
    trans = jnp.stack([dx, dy], -1)[:, None, :]
    coords = x.reshape(B, H * W, C)
    tc = jnp.einsum("bnc,bcd->bnd", coords, rot_T) + trans
    h0 = tc @ params["wp"] + params["bp"]
    h1 = jnp.maximum(h0 @ params["w1"] + params["b1"], 0.0)
    y = h1 @ params["w2"] + params["b2"]
    cw = params["color_w"][sample_idx]
    cb = params["color_b"][sample_idx]
    skip = (sample_idx == 0)[:, None]
    cw = jnp.where(skip, 1.0, cw)[:, None, :]
    cb = jnp.where(skip, 0.0, cb)[:, None, :]
    y = y * cw + cb
    img = y.reshape(B, H, W, OUT_CH)
    Hout, Wout = int(H * scale_factor), int(W * scale_factor)
    ry = jnp.asarray(bilinear_matrix(H, Hout))
    rx = jnp.asarray(bilinear_matrix(W, Wout))
    out = jnp.einsum("yh,bhwc->bywc", ry, img)
    out = jnp.einsum("xw,bywc->byxc", rx, out)
    return out


if __name__ == "__main__":
    B, H, W = 2, 16, 16
    num_samples = 4
    scale_factor = 2.0

    # Deterministic coordinate-grid input ([-1, 1]^2, NHWC with C=2 coords).
    ys = jnp.linspace(-1.0, 1.0, H)
    xs = jnp.linspace(-1.0, 1.0, W)
    gy, gx = jnp.meshgrid(ys, xs, indexing="ij")
    coords = jnp.stack([gx, gy], axis=-1)                     # (H, W, 2)
    x = jnp.broadcast_to(coords, (B, H, W, 2)).astype(jnp.float32)

    sample_idx = jnp.array([0, 2], dtype=jnp.int32)           # idx 0 skips color xform
    params = init_params(jax.random.PRNGKey(0), num_samples=num_samples)

    out, shifts = inr_forward(x, sample_idx, params,
                              scale_factor=scale_factor, training=True)
    out = jax.block_until_ready(out)

    assert out.shape == (B, int(H * scale_factor), int(W * scale_factor), OUT_CH)
    ref = reference_forward(x, sample_idx, params, scale_factor)
    np.testing.assert_allclose(np.asarray(out), np.asarray(ref), rtol=2e-2, atol=2e-2)

    print("KERNEL_OK")
</pallas_src>

<mosaic_0001>
module attributes {stable_mosaic.version = 11 : i64} {
  func.func @kernel(%arg0: i32, %arg1: memref<2x4xf32, #tpu.memory_space<smem>>, %arg2: memref<1x2x256xf32, #tpu.memory_space<vmem>>, %arg3: memref<32x2xf32, #tpu.memory_space<vmem>>, %arg4: memref<32x32xf32, #tpu.memory_space<vmem>>, %arg5: memref<32x1xf32, #tpu.memory_space<vmem>>, %arg6: memref<1x3x32xf32, #tpu.memory_space<vmem>>, %arg7: memref<1x3x1xf32, #tpu.memory_space<vmem>>, %arg8: memref<256x1024xf32, #tpu.memory_space<vmem>>, %arg9: memref<1x3x1024xf32, #tpu.memory_space<vmem>>) attributes {dimension_semantics = [#tpu.dimension_semantics<parallel>], iteration_bounds = array<i64: 2>, scalar_prefetch = 1 : i64, scratch_operands = 0 : i64, tpu.core_type = #tpu.core_type<tc>, window_params = [{transform_indices = @transform_0, window_bounds = array<i64: 1, 2, 256>}, {pipeline_mode = #tpu.pipeline_mode<synchronous>, transform_indices = @transform_1, window_bounds = array<i64: 32, 2>}, {pipeline_mode = #tpu.pipeline_mode<synchronous>, transform_indices = @transform_2, window_bounds = array<i64: 32, 32>}, {pipeline_mode = #tpu.pipeline_mode<synchronous>, transform_indices = @transform_3, window_bounds = array<i64: 32, 1>}, {transform_indices = @transform_4, window_bounds = array<i64: 1, 3, 32>}, {transform_indices = @transform_5, window_bounds = array<i64: 1, 3, 1>}, {pipeline_mode = #tpu.pipeline_mode<synchronous>, transform_indices = @transform_6, window_bounds = array<i64: 256, 1024>}, {transform_indices = @transform_7, window_bounds = array<i64: 1, 3, 1024>}]} {
    %0 = arith.index_cast %arg0 : i32 to index
    %c0 = arith.constant 0 : index
    %1 = memref.load %arg1[%0, %c0] : memref<2x4xf32, #tpu.memory_space<smem>>
    %2 = arith.index_cast %arg0 : i32 to index
    %c1 = arith.constant 1 : index
    %3 = memref.load %arg1[%2, %c1] : memref<2x4xf32, #tpu.memory_space<smem>>
    %4 = arith.index_cast %arg0 : i32 to index
    %c2 = arith.constant 2 : index
    %5 = memref.load %arg1[%4, %c2] : memref<2x4xf32, #tpu.memory_space<smem>>
    %6 = arith.index_cast %arg0 : i32 to index
    %c3 = arith.constant 3 : index
    %7 = memref.load %arg1[%6, %c3] : memref<2x4xf32, #tpu.memory_space<smem>>
    %c0_0 = arith.constant 0 : index
    %c0_1 = arith.constant 0 : index
    %c0_2 = arith.constant 0 : index
    %8 = vector.load %arg2[%c0_0, %c0_1, %c0_2] : memref<1x2x256xf32, #tpu.memory_space<vmem>>, vector<1x1x256xf32>
    %9 = vector.shape_cast %8 : vector<1x1x256xf32> to vector<1x256xf32>
    %c0_3 = arith.constant 0 : index
    %c1_4 = arith.constant 1 : index
    %c0_5 = arith.constant 0 : index
    %10 = vector.load %arg2[%c0_3, %c1_4, %c0_5] : memref<1x2x256xf32, #tpu.memory_space<vmem>>, vector<1x1x256xf32>
    %11 = vector.shape_cast %10 : vector<1x1x256xf32> to vector<1x256xf32>
    %12 = vector.broadcast %1 : f32 to vector<1x256xf32>
    %13 = arith.mulf %9, %12 : vector<1x256xf32>
    %14 = vector.broadcast %3 : f32 to vector<1x256xf32>
    %15 = arith.mulf %11, %14 : vector<1x256xf32>
    %16 = arith.subf %13, %15 : vector<1x256xf32>
    %17 = vector.broadcast %5 : f32 to vector<1x256xf32>
    %18 = arith.addf %16, %17 : vector<1x256xf32>
    %19 = vector.broadcast %3 : f32 to vector<1x256xf32>
    %20 = arith.mulf %9, %19 : vector<1x256xf32>
    %21 = vector.broadcast %1 : f32 to vector<1x256xf32>
    %22 = arith.mulf %11, %21 : vector<1x256xf32>
    %23 = arith.addf %20, %22 : vector<1x256xf32>
    %24 = vector.broadcast %7 : f32 to vector<1x256xf32>
    %25 = arith.addf %23, %24 : vector<1x256xf32>
    %c0_6 = arith.constant 0 : index
    %c0_7 = arith.constant 0 : index
    %26 = vector.load %arg3[%c0_6, %c0_7] : memref<32x2xf32, #tpu.memory_space<vmem>>, vector<32x1xf32>
    %27 = vector.broadcast %26 : vector<32x1xf32> to vector<32x256xf32>
    %28 = vector.broadcast %18 : vector<1x256xf32> to vector<32x256xf32>
    %29 = arith.mulf %27, %28 : vector<32x256xf32>
    %c0_8 = arith.constant 0 : index
    %c1_9 = arith.constant 1 : index
    %30 = vector.load %arg3[%c0_8, %c1_9] : memref<32x2xf32, #tpu.memory_space<vmem>>, vector<32x1xf32>
    %31 = vector.broadcast %30 : vector<32x1xf32> to vector<32x256xf32>
    %32 = vector.broadcast %25 : vector<1x256xf32> to vector<32x256xf32>
    %33 = arith.mulf %31, %32 : vector<32x256xf32>
    %34 = arith.addf %29, %33 : vector<32x256xf32>
    %c0_10 = arith.constant 0 : index
    %c0_11 = arith.constant 0 : index
    %35 = vector.load %arg4[%c0_10, %c0_11] : memref<32x32xf32, #tpu.memory_space<vmem>>, vector<32x32xf32>
    %cst = arith.constant dense<0.000000e+00> : vector<32x256xf32>
    %36 = tpu.matmul %35, %34, %cst {dimension_numbers = #tpu.dot_dimension_numbers<[1], [0], [0], [1], [0, 0, 1, 1], [], []>} : vector<32x32xf32>, vector<32x256xf32>, vector<32x256xf32> -> vector<32x256xf32>
    %c0_12 = arith.constant 0 : index
    %c0_13 = arith.constant 0 : index
    %37 = vector.load %arg5[%c0_12, %c0_13] : memref<32x1xf32, #tpu.memory_space<vmem>>, vector<32x1xf32>
    %38 = vector.broadcast %37 : vector<32x1xf32> to vector<32x256xf32>
    %39 = arith.addf %36, %38 : vector<32x256xf32>
    %cst_14 = arith.constant 0.000000e+00 : f32
    %40 = vector.broadcast %cst_14 : f32 to vector<32x256xf32>
    %41 = arith.maximumf %39, %40 : vector<32x256xf32>
    %c0_15 = arith.constant 0 : index
    %c0_16 = arith.constant 0 : index
    %c0_17 = arith.constant 0 : index
    %42 = vector.load %arg6[%c0_15, %c0_16, %c0_17] : memref<1x3x32xf32, #tpu.memory_space<vmem>>, vector<1x3x32xf32>
    %43 = vector.shape_cast %42 : vector<1x3x32xf32> to vector<3x32xf32>
    %cst_18 = arith.constant dense<0.000000e+00> : vector<3x256xf32>
    %44 = tpu.matmul %43, %41, %cst_18 {dimension_numbers = #tpu.dot_dimension_numbers<[1], [0], [0], [1], [0, 0, 1, 1], [], []>} : vector<3x32xf32>, vector<32x256xf32>, vector<3x256xf32> -> vector<3x256xf32>
    %c0_19 = arith.constant 0 : index
    %c0_20 = arith.constant 0 : index
    %c0_21 = arith.constant 0 : index
    %45 = vector.load %arg7[%c0_19, %c0_20, %c0_21] : memref<1x3x1xf32, #tpu.memory_space<vmem>>, vector<1x3x1xf32>
    %46 = vector.shape_cast %45 : vector<1x3x1xf32> to vector<3x1xf32>
    %47 = vector.broadcast %46 : vector<3x1xf32> to vector<3x256xf32>
    %48 = arith.addf %44, %47 : vector<3x256xf32>
    %c0_22 = arith.constant 0 : index
    %c0_23 = arith.constant 0 : index
    %49 = vector.load %arg8[%c0_22, %c0_23] : memref<256x1024xf32, #tpu.memory_space<vmem>>, vector<256x1024xf32>
    %cst_24 = arith.constant dense<0.000000e+00> : vector<3x1024xf32>
    %50 = tpu.matmul %48, %49, %cst_24 {dimension_numbers = #tpu.dot_dimension_numbers<[1], [0], [0], [1], [0, 0, 1, 1], [], []>} : vector<3x256xf32>, vector<256x1024xf32>, vector<3x1024xf32> -> vector<3x1024xf32>
    %c0_25 = arith.constant 0 : index
    %c0_26 = arith.constant 0 : index
    %c0_27 = arith.constant 0 : index
    %51 = vector.load %arg9[%c0_25, %c0_26, %c0_27] : memref<1x3x1024xf32, #tpu.memory_space<vmem>>, vector<1x3x1024xf32>
    %52 = vector.shape_cast %51 : vector<1x3x1024xf32> to vector<3x1024xf32>
    %53 = vector.shape_cast %50 : vector<3x1024xf32> to vector<1x3x1024xf32>
    tpu.vector_store %arg9[%c0_25, %c0_26, %c0_27], %53 {strides = array<i32>} : memref<1x3x1024xf32, #tpu.memory_space<vmem>>, vector<1x3x1024xf32>,
    return
  }
  func.func @transform_0(%arg0: i32, %arg1: memref<2x4xf32, #tpu.memory_space<smem>>) -> (i32, i32, i32) {
    %c0_i32 = arith.constant 0 : i32
    %c0_i32_0 = arith.constant 0 : i32
    %c0_i32_1 = arith.constant 0 : i32
    return %arg0, %c0_i32, %c0_i32_0 : i32, i32, i32
  }
  func.func @transform_1(%arg0: i32, %arg1: memref<2x4xf32, #tpu.memory_space<smem>>) -> (i32, i32) {
    %c0_i32 = arith.constant 0 : i32
    %c0_i32_0 = arith.constant 0 : i32
    %c0_i32_1 = arith.constant 0 : i32
    return %c0_i32, %c0_i32_0 : i32, i32
  }
  func.func @transform_2(%arg0: i32, %arg1: memref<2x4xf32, #tpu.memory_space<smem>>) -> (i32, i32) {
    %c0_i32 = arith.constant 0 : i32
    %c0_i32_0 = arith.constant 0 : i32
    %c0_i32_1 = arith.constant 0 : i32
    return %c0_i32, %c0_i32_0 : i32, i32
  }
  func.func @transform_3(%arg0: i32, %arg1: memref<2x4xf32, #tpu.memory_space<smem>>) -> (i32, i32) {
    %c0_i32 = arith.constant 0 : i32
    %c0_i32_0 = arith.constant 0 : i32
    %c0_i32_1 = arith.constant 0 : i32
    return %c0_i32, %c0_i32_0 : i32, i32
  }
  func.func @transform_4(%arg0: i32, %arg1: memref<2x4xf32, #tpu.memory_space<smem>>) -> (i32, i32, i32) {
    %c0_i32 = arith.constant 0 : i32
    %c0_i32_0 = arith.constant 0 : i32
    %c0_i32_1 = arith.constant 0 : i32
    return %arg0, %c0_i32, %c0_i32_0 : i32, i32, i32
  }
  func.func @transform_5(%arg0: i32, %arg1: memref<2x4xf32, #tpu.memory_space<smem>>) -> (i32, i32, i32) {
    %c0_i32 = arith.constant 0 : i32
    %c0_i32_0 = arith.constant 0 : i32
    %c0_i32_1 = arith.constant 0 : i32
    return %arg0, %c0_i32, %c0_i32_0 : i32, i32, i32
  }
  func.func @transform_6(%arg0: i32, %arg1: memref<2x4xf32, #tpu.memory_space<smem>>) -> (i32, i32) {
    %c0_i32 = arith.constant 0 : i32
    %c0_i32_0 = arith.constant 0 : i32
    %c0_i32_1 = arith.constant 0 : i32
    return %c0_i32, %c0_i32_0 : i32, i32
  }
  func.func @transform_7(%arg0: i32, %arg1: memref<2x4xf32, #tpu.memory_space<smem>>) -> (i32, i32, i32) {
    %c0_i32 = arith.constant 0 : i32
    %c0_i32_0 = arith.constant 0 : i32
    %c0_i32_1 = arith.constant 0 : i32
    return %arg0, %c0_i32, %c0_i32_0 : i32, i32, i32
  }
}

</mosaic_0001>

<bundles_post_ra>
// kernel: inr_forward.1
= control target key start
LH: loop header
LB: loop body
LE: loop exit
PB: predicated region body
PF: predicated region fallthrough
CT: control target
= control target key end

     0   :  { %s1875_s0 = inlined_call_operand.vmem [shape: f32[2,4], index: 0, kind: input, shape index: {}]   ;;  %s1876_s1 = inlined_call_operand.vmem [shape: f32[2,2,256], index: 1, kind: input, shape index: {}]   ;;  %s1877_s2 = inlined_call_operand.vmem [shape: f32[32,2], index: 2, kind: input, shape index: {}]   ;;  %s1878_s3 = inlined_call_operand.vmem [shape: f32[32,32], index: 3, kind: input, shape index: {}]   ;;  %s1879_s4 = inlined_call_operand.vmem [shape: f32[32,1], index: 4, kind: input, shape index: {}]   ;;  %s1880_s5 = inlined_call_operand.vmem [shape: f32[2,3,32], index: 5, kind: input, shape index: {}]   ;;  %s1881_s6 = inlined_call_operand.vmem [shape: f32[2,3,1], index: 6, kind: input, shape index: {}]   ;;  %s1882_s7 = inlined_call_operand.hbm [shape: f32[256,1024], index: 7, kind: input, shape index: {}]   ;;  %s1883_s8 = inlined_call_operand.vmem [shape: f32[2,3,1024], index: 8, kind: output, shape index: {}]  }
   0x1   :  { %s13_s29 = sshll.u32 %s1875_s0, 4  ;;  %s14_s29 = int_to_ptr.vmem [resolvable:$true] %s13_s29 }
   0x2   :  { %s1642_s30 = scalar_lea.vmem %s14_s29, 32  ;;  %p1647_p1 = scmp.lt.s32.totalorder %s14_s29, %s14_s29 }
   0x3   :  { %p1643_p0 = scmp.ne.s32.totalorder %s14_s29, %s1642_s30  ;;  %p1648_p2 = scmp.lt.s32.totalorder %s1642_s30, %s1642_s30 }
   0x5   :  { %p1649_p3 = por %p1648_p2, %p1647_p1 }
   0x7   :  { %p1650_p4 = pnand %p1649_p3, %p1643_p0 }
   0x9   :  { %1653 = shalt.err (!%p1650_p4)  }
   0xa   :  { %s1696_s9 = smov [#allocation3]  }
   0xb   :  { %16 = dma.vmem_to_smem %s14_s29, 32, %s1696_s9, [#allocation2] }
   0xc   :  { %1686 = dma.done.wait [#allocation2], 32 }
   0xd   :  { %1687 = vsyncadd [#allocation2], 4294967264 }
   0xe   :  { %18 = sfence }
   0xf   :  { %19 = vsyncpa [#allocation5], 0  ;;  %s1751_s10 = smov 0  }
  0x10 LB: > { %s1757_s0 = sadd.s32 4294967295, %s1694_s10   ;;  %p1316_p5 = scmp.ge.s32.totalorder %s1694_s10, 1  ;;  %s1694_s10 = sphi %s1751_s10, %s25_s10  }
  0x11   : > { %p218_p6 = scmp.lt.s32.totalorder %s1694_s10, 3  ;;  %s1697_s11 = smov [#allocation4]  }
  0x12   : > { %s239_s12 = sshll.u32 %s1697_s11, 4  ;;  %p1884_p8 = scmp.eq.s32.totalorder %s1757_s0, 0  ;;  %s240_s12 = int_to_ptr.vmem [resolvable:$true] %s239_s12 }
  0x13   : > { %p1761_p7 = pnand %p1316_p5, %p218_p6  ;;  %s1654_s17 = scalar_lea.hbm %s1882_s7, 32768 }
  0x14   : > { %p1655_p11 = scmp.ne.s32.totalorder %s1882_s7, %s1654_s17  ;;  %p1661_p1 = scmp.lt.u32.totalorder %s1654_s17, %s1882_s7 }
  0x15   : > { %s1886_s13 = scalar_select %p1761_p7, 1, 0 }
  0x16   : > { %p1614_p9 = pneg %p1761_p7 }
  0x18   : > { %p1770_p10 = pnand %p1884_p8, %p1614_p9 }
  0x1a   : > { %p1656_p12 = pneg %p1770_p10 }
  0x1c   : > { %p1657_p13 = pnand %p1656_p12, %p1655_p11 }
  0x1e   : > { %p1658_p0 = pneg %p1657_p13 }
  0x20   : > { %p1663_p2 = pnand %p1661_p1, %p1658_p0 }
  0x22   : > { %1666 = shalt.err (!%p1663_p2)
}
  0x23   : > { %s1667_s22 = scalar_lea.vmem %s240_s12, 32768  ;;  %p1675_p6 = scmp.lt.s32.totalorder %s240_s12, %s240_s12 }
  0x24   : > { %p1668_p3 = scmp.ne.s32.totalorder %s240_s12, %s1667_s22  ;;  %p1676_p9 = scmp.lt.s32.totalorder %s1667_s22, %s1667_s22 }
  0x26   : > { %p1670_p4 = pnand %p1668_p3, %p1656_p12  ;;  %p1677_p8 = por %p1676_p9, %p1675_p6 }
  0x28   : > { %p1671_p5 = pneg %p1670_p4 }
  0x2a   : > { %p1678_p7 = pnand %p1677_p8, %p1671_p5 }
  0x2c   : > { %1681 = shalt.err (!%p1678_p7)
}
  0x2d   : > { %s1698_s23 = smov 1024   ;;  %s1699_s24 = smov 64  }
  0x2e   : > { %1617 = dma.hbm_to_vmem [thread:$0]  (!%p1770_p10), %s1882_s7, 32768, %s240_s12, [#allocation5], %s1698_s23, %s1698_s23, %s1699_s24  }
  0x2f   : > { %p1888_p11 = scmp.ne.s32.totalorder %s1886_s13, 0 }
  0x30   : > { %p1889_p13 = scmp.eq.s32.totalorder (!%p1888_p11), %s1757_s0, 0 }
  0x31   : > { %277 = sbr.rel (%p1888_p11) target bundleno = 942 (0x3ae), region = 48 }
  0x38   : > { %1689 = dma.done.wait (%p1889_p13), [#allocation5], 32768   ;;  %p1890_p12 = pmov %p1889_p13 }
  0x39   : > { %v1700_v0 = vmov 1   ;;  %v1701_v1 = vmov 0   ;;  %v358_v2 = vld [vmem:[%s1877_s2] sm:$0xff]  ;;  %v359_v3 = vld [vmem:[%s1877_s2 + $0x8] sm:$0xff]  ;;  %v360_v4 = vld [vmem:[%s1877_s2 + $0x10] sm:$0xff]  ;;  %v1702_v6 = vmov 0.0   ;;  %v383_v16 = vlaneseq }
  0x3a   : > { %1691 = vsyncadd (%p1890_p12), [#allocation5], 4294934528  ;;  %1636 = vset.pattern.permute.xlu1 %v1700_v0  ;;  %1635 = vset.pattern.permute.xlu0 %v1701_v1  ;;  %v361_v5 = vld [vmem:[%s1877_s2 + $0x18] sm:$0xff]  ;;  %p317_p7 = scmp.lt.s32.totalorder %s1757_s0, 1  ;;  %v448_v7 = vld [vmem:[%s1879_s4] sm:$0xff]  ;;  %s1327_s27 = sshll.u32 %s1757_s0, 7 }
  0x3b   : > { %402 = vperm.xlu1 %1636, %v358_v2   ;;  %364 = vperm.xlu0 %1635, %v358_v2   ;;  %v449_v8 = vld [vmem:[%s1879_s4 + $0x8] sm:$0xff]  ;;  %v450_v9 = vld [vmem:[%s1879_s4 + $0x10] sm:$0xff]  ;;  %v451_v11 = vld [vmem:[%s1879_s4 + $0x18] sm:$0xff]  ;;  %s337_s28 = sadd.s32 1, %s1327_s27  ;;  %s336_s29 = sld [smem:[#allocation3 + %s1327_s27]]  ;;  %v384_v21 = vshrl.u32 %v383_v16, 7 }
  0x3c   : > { %549 = vmatprep.mubr.f32.mxu0 %v1702_v6  ;;  %656 = vmatprep.mubr.f32.mxu1 %v1702_v6  ;;  %s1812_s14 = scalar_select %p317_p7, %s1757_s0, 1  ;;  %vm472_vm0 = vcmask 261120  }
  0x3d   : > { %s338_s30 = sld [smem:[#allocation3 + %s337_s28]]  ;;  %s341_s9 = sadd.s32 3, %s1327_s27  ;;  %v385_v26 = vsub.s32 0, %v384_v21  ;;  %v389_v27 = vsub.s32 1, %v384_v21  ;;  %v687_v21 = vld [vmem:[#allocation4 + $0xc0] sm:$0xff] }
  0x3e   : > { %s1815_s15 = sshll.u32 %s1812_s14, 2  ;;  %s339_s11 = sadd.s32 2, %s1327_s27 }
  0x3f   : > { %406 = vperm.xlu1 %1636, %v359_v3   ;;  %369 = vperm.xlu0 %1635, %v359_v3   ;;  %s329_s22 = scalar_lea.vmem %s1881_s6, %s1815_s15  ;;  %s321_s16 = scalar_lea.vmem %s1876_s1, %s1815_s15 }
  0x40   : > { %v583_v10 = vld [vmem:[%s329_s22] sm:$0x7]  ;;  %s342_s17 = sld [smem:[#allocation3 + %s341_s9]]  ;;  %s325_s28 = scalar_lea.vmem %s1880_s5, %s1815_s15 }
  0x41   : > { %s340_s18 = sld [smem:[#allocation3 + %s339_s11]]  ;;  %v343_v12 = vld [vmem:[%s321_s16] ss:$2 sm:$0x3]  ;;  %v346_v14 = vstv %s336_s29  ;;  %s1337_s15 = sshll.u32 %s1812_s14, 5 }
  0x42   : > { %v1328_v13 = vld [vmem:[%s321_s16 + $0x1] ss:$2 sm:$0x3]  ;;  %v347_v19 = vmul.f32 %v346_v14, %v343_v12  ;;  %s334_s9 = scalar_lea.vmem %s1883_s8, %s1337_s15 }
  0x43   : > { %1637 = vset.pattern.permute.xlu1 %v1701_v1  ;;  %374 = vperm.xlu0 %1635, %v360_v4   ;;  %v348_v15 = vstv %s338_s30  ;;  %v354_v18 = vmul.f32 %v1328_v13, %v346_v14  ;;  %v663_v14 = vld [vmem:[#allocation4] sm:$0xff] }
  0x44   : > { %379 = vperm.xlu1 %1637, %v361_v5   ;;  %v353_v17 = vmul.f32 %v348_v15, %v343_v12  ;;  %v349_v20 = vmul.f32 %v1328_v13, %v348_v15  ;;  %v672_v12 = vld [vmem:[#allocation4 + $0x48] sm:$0xff]  ;;  %v671_v15 = vld [vmem:[#allocation4 + $0x40] sm:$0xff] }
  0x45   : > { %v1356_v16 = vpack.c.bf16 %v671_v15, %v663_v14  ;;  %v848_v14 = vld [vmem:[#allocation4 + $0x5c8] sm:$0xff] }
  0x46   : > { %v355_v22 = vadd.f32 %v354_v18, %v353_v17  ;;  %v350_v23 = vsub.f32 %v347_v19, %v349_v20  ;;  %v356_v24 = vstv %s342_s17  ;;  %v680_v17 = vld [vmem:[#allocation4 + $0x88] sm:$0xff]  ;;  %v679_v20 = vld [vmem:[#allocation4 + $0x80] sm:$0xff] }
  0x47   : > { %1638 = vset.pattern.permute.xlu0 %v1700_v0  ;;  %v351_v25 = vstv %s340_s18  ;;  %v688_v18 = vld [vmem:[#allocation4 + $0xc8] sm:$0xff] }
  0x48   : > { %1639 = vset.pattern.permute.xlu1 %v1700_v0  ;;  %410 = vperm.xlu0 %1638, %v360_v4   ;;  %v357_v28 = vadd.f32 %v356_v24, %v355_v22  ;;  %v352_v29 = vadd.f32 %v351_v25, %v350_v23  ;;  %v1358_v19 = vpack.c.bf16 %v688_v18, %v680_v17  ;;  %v696_v22 = vld [vmem:[#allocation4 + $0x108] sm:$0xff]  ;;  %v695_v25 = vld [vmem:[#allocation4 + $0x100] sm:$0xff] }
  0x49   : > { %414 = vperm.xlu1 %1639, %v361_v5   ;;  %v704_v23 = vld [vmem:[#allocation4 + $0x148] sm:$0xff]  ;;  %v847_v17 = vld [vmem:[#allocation4 + $0x5c0] sm:$0xff] }
  0x4a   : > { %v421_v30 = vrot.slane %v357_v28, %v385_v26  ;;  %v425_v31 = vrot.slane %v357_v28, %v389_v27  ;;  %v386_v32 = vrot.slane %v352_v29, %v385_v26  ;;  %v390_v33 = vrot.slane %v352_v29, %v389_v27  ;;  %v703_v26 = vld [vmem:[#allocation4 + $0x140] sm:$0xff]  ;;  %v712_v28 = vld [vmem:[#allocation4 + $0x188] sm:$0xff] }
  0x4b   : > { %v1362_v24 = vpack.c.bf16 %v704_v23, %v696_v22  ;;  %v1364_v27 = vpack.c.bf16 %v703_v26, %v695_v25  ;;  %v720_v29 = vld [vmem:[#allocation4 + $0x1c8] sm:$0xff]  ;;  %v863_v22 = vld [vmem:[#allocation4 + $0x640] sm:$0xff] }
  0x4c   : > { %1641 = vset.pattern.permute.xlu0 %v1701_v1  ;;  %v880_v25 = vld [vmem:[#allocation4 + $0x6c8] sm:$0xff] }
  0x4d   : > { %1640 = vset.pattern.permute.xlu1 %v1701_v1  ;;  %459 = vperm.xlu0 %1641, %v449_v8   ;;  %v445_v8 = vld [vmem:[%s1878_s3 + $0x8] sm:$0xff] }
  0x4e   : > { %454 = vperm.xlu1 %1640, %v448_v7   ;;  %v444_v7 = vld [vmem:[%s1878_s3] sm:$0xff] }
  0x51   : > { %586 = vperm.xlu0 %1641, %v583_v10   ;;  %v447_v10 = vld [vmem:[%s1878_s3 + $0x18] sm:$0xff] }
  0x52   : > { %464 = vperm.xlu1 %1640, %v450_v9   ;;  %v446_v9 = vld [vmem:[%s1878_s3 + $0x10] sm:$0xff] }
  0x56   : > { %469 = vperm.xlu1 %1640, %v451_v11   ;;  %v664_v11 = vld [vmem:[#allocation4 + $0x8] sm:$0xff] }
  0x57   : > { %v1354_v13 = vpack.c.bf16 %v672_v12, %v664_v11  ;;  %v831_v11 = vld [vmem:[#allocation4 + $0x540] sm:$0xff] }
  0xba   : > { %v403_v34 = vpop.permute.xlu1 %402  ;;  %v365_v35 = vpop.permute.xlu0 %364 }
  0xbb   : > { %v428_v36 = vmul.f32 %v421_v30, %v403_v34  ;;  %v429_v37 = vmul.f32 %v425_v31, %v403_v34  ;;  %v393_v38 = vmul.f32 %v386_v32, %v365_v35  ;;  %v394_v39 = vmul.f32 %v390_v33, %v365_v35  ;;  %v728_v34 = vld [vmem:[#allocation4 + $0x208] sm:$0xff] }
  0xbc   : > { %v736_v35 = vld [vmem:[#allocation4 + $0x248] sm:$0xff] }
  0xbd   : > { %v437_v46 = vadd.f32 %v429_v37, %v394_v39  ;;  %v436_v48 = vadd.f32 %v428_v36, %v393_v38  ;;  %v1370_v36 = vpack.c.bf16 %v736_v35, %v728_v34  ;;  %v727_v37 = vld [vmem:[#allocation4 + $0x200] sm:$0xff] }
  0xbe   : > { %v407_v40 = vpop.permute.xlu1 %406  ;;  %v370_v41 = vpop.permute.xlu0 %369  ;;  %v735_v38 = vld [vmem:[#allocation4 + $0x240] sm:$0xff] }
  0xbf   : > { %v430_v42 = vmul.f32 %v421_v30, %v407_v40  ;;  %v431_v43 = vmul.f32 %v425_v31, %v407_v40  ;;  %v395_v44 = vmul.f32 %v386_v32, %v370_v41  ;;  %v396_v45 = vmul.f32 %v390_v33, %v370_v41  ;;  %v744_v40 = vld [vmem:[#allocation4 + $0x288] sm:$0xff]  ;;  %v895_v34 = vld [vmem:[#allocation4 + $0x740] sm:$0xff] }
  0xc0   : > { %v1372_v39 = vpack.c.bf16 %v735_v38, %v727_v37  ;;  %v752_v41 = vld [vmem:[#allocation4 + $0x2c8] sm:$0xff] }
  0xc1   : > { %v439_v47 = vadd.f32 %v431_v43, %v396_v45  ;;  %v438_v49 = vadd.f32 %v430_v42, %v395_v44  ;;  %v1374_v42 = vpack.c.bf16 %v752_v41, %v744_v40  ;;  %v743_v43 = vld [vmem:[#allocation4 + $0x280] sm:$0xff] }
  0xc2   : > { %v375_v50 = vpop.permute.xlu0 %374  ;;  %v751_v44 = vld [vmem:[#allocation4 + $0x2c0] sm:$0xff] }
  0xc3   : > { %v380_v51 = vpop.permute.xlu1 %379  ;;  %v1338_v52 = vpack.c.bf16 %v439_v47, %v437_v46  ;;  %v1340_v53 = vpack.c.bf16 %v438_v49, %v436_v48  ;;  %v397_v55 = vmul.f32 %v386_v32, %v375_v50  ;;  %v398_v56 = vmul.f32 %v390_v33, %v375_v50  ;;  %v760_v46 = vld [vmem:[#allocation4 + $0x308] sm:$0xff]  ;;  %v759_v49 = vld [vmem:[#allocation4 + $0x300] sm:$0xff] }
  0xc4   : > { %v399_v60 = vmul.f32 %v386_v32, %v380_v51  ;;  %v400_v61 = vmul.f32 %v390_v33, %v380_v51  ;;  %v719_v32 = vld [vmem:[#allocation4 + $0x1c0] sm:$0xff]  ;;  %v1376_v45 = vpack.c.bf16 %v751_v44, %v743_v43  ;;  %v768_v47 = vld [vmem:[#allocation4 + $0x348] sm:$0xff] }
  0xc5   : > { %1339 = vmatprep.subr.bf16.mxu0 %v1338_v52  ;;  %v1378_v48 = vpack.c.bf16 %v768_v47, %v760_v46  ;;  %v767_v50 = vld [vmem:[#allocation4 + $0x340] sm:$0xff]  ;;  %v776_v52 = vld [vmem:[#allocation4 + $0x388] sm:$0xff] }
  0xc6   : > { %1341 = vmatpush1.bf16.msra.mxu0 %v1340_v53  ;;  %v1380_v51 = vpack.c.bf16 %v767_v50, %v759_v49  ;;  %v784_v53 = vld [vmem:[#allocation4 + $0x3c8] sm:$0xff] }
  0xc7   : > { %v411_v54 = vpop.permute.xlu0 %410 }
  0xc8   : > { %v432_v57 = vmul.f32 %v421_v30, %v411_v54  ;;  %v433_v58 = vmul.f32 %v425_v31, %v411_v54  ;;  %v415_v59 = vpop.permute.xlu1 %414  ;;  %v1382_v54 = vpack.c.bf16 %v784_v53, %v776_v52 }
  0xc9   : > { %v434_v62 = vmul.f32 %v421_v30, %v415_v59  ;;  %v435_v63 = vmul.f32 %v425_v31, %v415_v59  ;;  %v1366_v30 = vpack.c.bf16 %v720_v29, %v712_v28  ;;  %v711_v31 = vld [vmem:[#allocation4 + $0x180] sm:$0xff]  ;;  %v800_v59 = vld [vmem:[#allocation4 + $0x448] sm:$0xff] }
  0xca   : > { %v440_v0 = vadd.f32 %v432_v57, %v397_v55  ;;  %v441_v1 = vadd.f32 %v433_v58, %v398_v56  ;;  %v1368_v33 = vpack.c.bf16 %v719_v32, %v711_v31  ;;  %v775_v55 = vld [vmem:[#allocation4 + $0x380] sm:$0xff]  ;;  %v792_v58 = vld [vmem:[#allocation4 + $0x408] sm:$0xff] }
  0xcb   : > { %v442_v2 = vadd.f32 %v434_v62, %v399_v60  ;;  %v443_v3 = vadd.f32 %v435_v63, %v400_v61  ;;  %v783_v56 = vld [vmem:[#allocation4 + $0x3c0] sm:$0xff]  ;;  %v1386_v60 = vpack.c.bf16 %v800_v59, %v792_v58  ;;  %v896_v31 = vld [vmem:[#allocation4 + $0x748] sm:$0xff] }
  0xcc   : > { %v1384_v57 = vpack.c.bf16 %v783_v56, %v775_v55  ;;  %v791_v61 = vld [vmem:[#allocation4 + $0x400] sm:$0xff] }
  0xcd   : > { %v1342_v4 = vpack.c.bf16 %v443_v3, %v441_v1  ;;  %v1344_v5 = vpack.c.bf16 %v442_v2, %v440_v0  ;;  %v799_v62 = vld [vmem:[#allocation4 + $0x440] sm:$0xff]  ;;  %v808_v0 = vld [vmem:[#allocation4 + $0x488] sm:$0xff] }
  0xce   : > { %v1388_v63 = vpack.c.bf16 %v799_v62, %v791_v61  ;;  %v816_v1 = vld [vmem:[#allocation4 + $0x4c8] sm:$0xff]  ;;  %v807_v3 = vld [vmem:[#allocation4 + $0x480] sm:$0xff] }
  0xcf   : > { %1343 = vmatprep.subr.bf16.mxu0 %v1342_v4  ;;  %v1390_v2 = vpack.c.bf16 %v816_v1, %v808_v0  ;;  %v815_v4 = vld [vmem:[#allocation4 + $0x4c0] sm:$0xff]  ;;  %v666_v0 = vld [vmem:[#allocation4 + $0x18] sm:$0xff] }
  0xd0   : > { %1345 = vmatpush1.bf16.msra.mxu0 %v1344_v5  ;;  %v1392_v5 = vpack.c.bf16 %v815_v4, %v807_v3  ;;  %v879_v28 = vld [vmem:[#allocation4 + $0x6c0] sm:$0xff]  ;;  %v674_v1 = vld [vmem:[#allocation4 + $0x58] sm:$0xff] }
  0xd1   : > { %1355 = vmatprep.subr.bf16.mxu0 %v1354_v13  ;;  %v840_v13 = vld [vmem:[#allocation4 + $0x588] sm:$0xff] }
  0xd2   : > { %v1398_v15 = vpack.c.bf16 %v848_v14, %v840_v13 }
  0xd3   : > { %1329 = vmatmul.mubr.msk.f32.vlgmr.msra.gmra.mrb[0].mxu0 %vm472_vm0, %v444_v7  ;;  %v824_v7 = vld [vmem:[#allocation4 + $0x508] sm:$0xff] }
  0xd4   : > { %555 = vmatprep.mubr.f32.mxu0 %v1702_v6  ;;  %1357 = vmatpush1.bf16.msra.mxu0 %v1356_v16  ;;  %v839_v16 = vld [vmem:[#allocation4 + $0x580] sm:$0xff] }
  0xd5   : > { %1359 = vmatprep.subr.bf16.mxu0 %v1358_v19  ;;  %v1400_v18 = vpack.c.bf16 %v847_v17, %v839_v16  ;;  %v856_v19 = vld [vmem:[#allocation4 + $0x608] sm:$0xff]  ;;  %v689_v16 = vld [vmem:[#allocation4 + $0xd0] sm:$0xff]  ;;  %v698_v17 = vld [vmem:[#allocation4 + $0x118] sm:$0xff] }
  0xd7   : > { %1330 = vmatmul.mubr.msk.f32.gmra.mrb[2].mxu0 %vm472_vm0, %v445_v8  ;;  %v832_v8 = vld [vmem:[#allocation4 + $0x548] sm:$0xff] }
  0xd8   : > { %561 = vmatprep.mubr.f32.mxu0 %v1702_v6 }
  0xdb   : > { %1331 = vmatmul.mubr.msk.f32.gmra.mrb[4].mxu0 %vm472_vm0, %v446_v9  ;;  %v1394_v9 = vpack.c.bf16 %v832_v8, %v824_v7  ;;  %v1418_v7 = vpack.c.bf16 %v674_v1, %v666_v0  ;;  %v665_v8 = vld [vmem:[#allocation4 + $0x10] sm:$0xff]  ;;  %v826_v0 = vld [vmem:[#allocation4 + $0x518] sm:$0xff] }
  0xdc   : > { %567 = vmatprep.mubr.f32.mxu0 %v1702_v6  ;;  %v1360_v6 = vpack.c.bf16 %v687_v21, %v679_v20  ;;  %v864_v20 = vld [vmem:[#allocation4 + $0x648] sm:$0xff]  ;;  %v834_v1 = vld [vmem:[#allocation4 + $0x558] sm:$0xff] }
  0xdd   : > { %v1402_v21 = vpack.c.bf16 %v864_v20, %v856_v19 }
  0xde   : > { %1361 = vmatpush1.bf16.msra.mxu0 %v1360_v6  ;;  %v855_v6 = vld [vmem:[#allocation4 + $0x600] sm:$0xff] }
  0xdf   : > { %1332 = vmatmul.mubr.msk.f32.gmra.mrb[6].mxu0 %vm472_vm0, %v447_v10  ;;  %1363 = vmatprep.subr.bf16.mxu0 %v1362_v24  ;;  %v823_v10 = vld [vmem:[#allocation4 + $0x500] sm:$0xff]  ;;  %v1404_v23 = vpack.c.bf16 %v863_v22, %v855_v6  ;;  %v872_v24 = vld [vmem:[#allocation4 + $0x688] sm:$0xff]  ;;  %v705_v6 = vld [vmem:[#allocation4 + $0x150] sm:$0xff] }
  0xe0   : > { %v1396_v12 = vpack.c.bf16 %v831_v11, %v823_v10  ;;  %v1406_v26 = vpack.c.bf16 %v880_v25, %v872_v24  ;;  %v682_v10 = vld [vmem:[#allocation4 + $0x98] sm:$0xff] }
  0xe1   : > { %v690_v11 = vld [vmem:[#allocation4 + $0xd8] sm:$0xff] }
  0xe2   : > { %1365 = vmatpush1.bf16.msra.mxu0 %v1364_v27  ;;  %v871_v27 = vld [vmem:[#allocation4 + $0x680] sm:$0xff]  ;;  %v1422_v14 = vpack.c.bf16 %v690_v11, %v682_v10  ;;  %v714_v22 = vld [vmem:[#allocation4 + $0x198] sm:$0xff]  ;;  %v841_v11 = vld [vmem:[#allocation4 + $0x590] sm:$0xff] }
  0xe3   : > { %1367 = vmatprep.subr.bf16.mxu0 %v1366_v30  ;;  %v1408_v29 = vpack.c.bf16 %v879_v28, %v871_v27  ;;  %v888_v30 = vld [vmem:[#allocation4 + $0x708] sm:$0xff]  ;;  %v721_v27 = vld [vmem:[#allocation4 + $0x1d0] sm:$0xff]  ;;  %v730_v28 = vld [vmem:[#allocation4 + $0x218] sm:$0xff] }
  0xe4   : > { %v1410_v32 = vpack.c.bf16 %v896_v31, %v888_v30 }
  0xe6   : > { %1369 = vmatpush1.bf16.msra.mxu0 %v1368_v33  ;;  %v887_v33 = vld [vmem:[#allocation4 + $0x700] sm:$0xff] }
  0xe7   : > { %1371 = vmatprep.subr.bf16.mxu0 %v1370_v36  ;;  %v1412_v35 = vpack.c.bf16 %v895_v34, %v887_v33  ;;  %v455_v36 = vpop.permute.xlu1 %454  ;;  %v737_v33 = vld [vmem:[#allocation4 + $0x250] sm:$0xff]  ;;  %v746_v34 = vld [vmem:[#allocation4 + $0x298] sm:$0xff] }
  0xea   : > { %1373 = vmatpush1.bf16.msra.mxu0 %v1372_v39  ;;  %v460_v39 = vpop.permute.xlu0 %459 }
  0xeb   : > { %1375 = vmatprep.subr.bf16.mxu0 %v1374_v42 }
  0xee   : > { %1377 = vmatpush1.bf16.msra.mxu0 %v1376_v45  ;;  %v465_v45 = vpop.permute.xlu1 %464 }
  0xef   : > { %1379 = vmatprep.subr.bf16.mxu0 %v1378_v48 }
  0xf2   : > { %1381 = vmatpush1.bf16.msra.mxu0 %v1380_v51  ;;  %v470_v56 = vpop.permute.xlu1 %469 }
  0xf3   : > { %1383 = vmatprep.subr.bf16.mxu0 %v1382_v54 }
  0xf6   : > { %1385 = vmatpush1.bf16.msra.mxu0 %v1384_v57 }
  0xf7   : > { %1387 = vmatprep.subr.bf16.mxu0 %v1386_v60 }
  0xfa   : > { %1389 = vmatpush1.bf16.msra.mxu0 %v1388_v63 }
  0xfb   : > { %1391 = vmatprep.subr.bf16.mxu0 %v1390_v2 }
  0xfe   : > { %1393 = vmatpush1.bf16.msra.mxu0 %v1392_v5 }
  0xff   : > { %1395 = vmatprep.subr.bf16.mxu0 %v1394_v9  ;;  %v673_v9 = vld [vmem:[#allocation4 + $0x50] sm:$0xff] }
 0x100   : > { %v1420_v13 = vpack.c.bf16 %v673_v9, %v665_v8  ;;  %v850_v8 = vld [vmem:[#allocation4 + $0x5d8] sm:$0xff] }
 0x102   : > { %1397 = vmatpush1.bf16.msra.mxu0 %v1396_v12  ;;  %v582_v12 = vld [vmem:[%s325_s28] sm:$0x7] }
 0x103   : > { %1399 = vmatprep.subr.bf16.mxu0 %v1398_v15  ;;  %v681_v15 = vld [vmem:[#allocation4 + $0x90] sm:$0xff] }
 0x104   : > { %v1424_v19 = vpack.c.bf16 %v689_v16, %v681_v15 }
 0x106   : > { %1401 = vmatpush1.bf16.msra.mxu0 %v1400_v18  ;;  %v706_v18 = vld [vmem:[#allocation4 + $0x158] sm:$0xff] }
 0x107   : > { %1403 = vmatprep.subr.bf16.mxu0 %v1402_v21  ;;  %v1426_v20 = vpack.c.bf16 %v706_v18, %v698_v17  ;;  %v697_v21 = vld [vmem:[#allocation4 + $0x110] sm:$0xff] }
 0x108   : > { %v1428_v24 = vpack.c.bf16 %v705_v6, %v697_v21  ;;  %v857_v17 = vld [vmem:[#allocation4 + $0x610] sm:$0xff] }
 0x109   : > { %v865_v18 = vld [vmem:[#allocation4 + $0x650] sm:$0xff] }
 0x10a   : > { %1405 = vmatpush1.bf16.msra.mxu0 %v1404_v23  ;;  %v722_v23 = vld [vmem:[#allocation4 + $0x1d8] sm:$0xff]  ;;  %v1468_v21 = vpack.c.bf16 %v865_v18, %v857_v17  ;;  %v701_v17 = vld [vmem:[#allocation4 + $0x130] sm:$0xff] }
 0x10b   : > { %1407 = vmatprep.subr.bf16.mxu0 %v1406_v26  ;;  %v1430_v25 = vpack.c.bf16 %v722_v23, %v714_v22  ;;  %v713_v26 = vld [vmem:[#allocation4 + $0x190] sm:$0xff] }
 0x10c   : > { %v1432_v30 = vpack.c.bf16 %v721_v27, %v713_v26  ;;  %v873_v22 = vld [vmem:[#allocation4 + $0x690] sm:$0xff] }
 0x10d   : > { %v881_v23 = vld [vmem:[#allocation4 + $0x6d0] sm:$0xff] }
 0x10e   : > { %1409 = vmatpush1.bf16.msra.mxu0 %v1408_v29  ;;  %v738_v29 = vld [vmem:[#allocation4 + $0x258] sm:$0xff]  ;;  %v1472_v26 = vpack.c.bf16 %v881_v23, %v873_v22  ;;  %v709_v18 = vld [vmem:[#allocation4 + $0x170] sm:$0xff] }
 0x10f   : > { %1411 = vmatprep.subr.bf16.mxu0 %v1410_v32  ;;  %v1434_v31 = vpack.c.bf16 %v738_v29, %v730_v28  ;;  %v729_v32 = vld [vmem:[#allocation4 + $0x210] sm:$0xff]  ;;  %v1556_v23 = vpack.c.bf16 %v709_v18, %v701_v17  ;;  %v804_v17 = vld [vmem:[#allocation4 + $0x468] sm:$0xff]  ;;  %v798_v18 = vld [vmem:[#allocation4 + $0x438] sm:$0xff] }
 0x110   : > { %v889_v28 = vld [vmem:[#allocation4 + $0x710] sm:$0xff] }
 0x111   : > { %v897_v29 = vld [vmem:[#allocation4 + $0x750] sm:$0xff] }
 0x112   : > { %1413 = vmatpush1.bf16.msra.mxu0 %v1412_v35  ;;  %v754_v35 = vld [vmem:[#allocation4 + $0x2d8] sm:$0xff] }
 0x1a6   : > { %v551_v37 = vpop.f32.mrb[0].mxu0 }
 0x1a7   : > { %v553_v38 = vpop.f32.mrb[1].mxu0  ;;  %v552_v40 = vadd.f32 %v551_v37, %v455_v36  ;;  %v1438_v37 = vpack.c.bf16 %v754_v35, %v746_v34  ;;  %v914_v35 = vld [vmem:[#allocation4 + $0x7d8] sm:$0xff] }
 0x1a8   : > { %v554_v41 = vadd.f32 %v553_v38, %v455_v36  ;;  %v1436_v36 = vpack.c.bf16 %v737_v33, %v729_v32  ;;  %v745_v38 = vld [vmem:[#allocation4 + $0x290] sm:$0xff]  ;;  %v912_v32 = vld [vmem:[#allocation4 + $0x7c8] sm:$0xff]  ;;  %v906_v33 = vld [vmem:[#allocation4 + $0x798] sm:$0xff] }
 0x1a9   : > { %v574_v47 = vmax.f32 %v552_v40, 0.0  ;;  %v762_v40 = vld [vmem:[#allocation4 + $0x318] sm:$0xff] }
 0x1aa   : > { %v557_v42 = vpop.f32.mrb[2].mxu0  ;;  %v575_v49 = vmax.f32 %v554_v41, 0.0  ;;  %v770_v41 = vld [vmem:[#allocation4 + $0x358] sm:$0xff] }
 0x1ab   : > { %v558_v43 = vadd.f32 %v557_v42, %v460_v39  ;;  %v559_v44 = vpop.f32.mrb[3].mxu0 }
 0x1ac   : > { %v560_v46 = vadd.f32 %v559_v44, %v460_v39  ;;  %v753_v39 = vld [vmem:[#allocation4 + $0x2d0] sm:$0xff] }
 0x1ad   : > { %v576_v48 = vmax.f32 %v558_v43, 0.0  ;;  %v1440_v42 = vpack.c.bf16 %v753_v39, %v745_v38  ;;  %v1442_v43 = vpack.c.bf16 %v770_v41, %v762_v40  ;;  %v761_v44 = vld [vmem:[#allocation4 + $0x310] sm:$0xff]  ;;  %v1478_v38 = vpack.c.bf16 %v914_v35, %v906_v33  ;;  %v742_v33 = vld [vmem:[#allocation4 + $0x278] sm:$0xff] }
 0x1ae   : > { %v577_v50 = vmax.f32 %v560_v46, 0.0  ;;  %v563_v51 = vpop.f32.mrb[4].mxu0  ;;  %v778_v46 = vld [vmem:[#allocation4 + $0x398] sm:$0xff]  ;;  %v905_v40 = vld [vmem:[#allocation4 + $0x790] sm:$0xff] }
 0x1af   : > { %v565_v52 = vpop.f32.mrb[5].mxu0  ;;  %v1348_v53 = vpack.c.bf16 %v576_v48, %v574_v47  ;;  %v564_v55 = vadd.f32 %v563_v51, %v465_v45  ;;  %v786_v47 = vld [vmem:[#allocation4 + $0x3d8] sm:$0xff]  ;;  %v785_v51 = vld [vmem:[#allocation4 + $0x3d0] sm:$0xff] }
 0x1b0   : > { %v1346_v54 = vpack.c.bf16 %v577_v50, %v575_v49  ;;  %v566_v57 = vadd.f32 %v565_v52, %v465_v45  ;;  %v769_v45 = vld [vmem:[#allocation4 + $0x350] sm:$0xff]  ;;  %v1446_v49 = vpack.c.bf16 %v786_v47, %v778_v46  ;;  %v794_v52 = vld [vmem:[#allocation4 + $0x418] sm:$0xff] }
 0x1b1   : > { %v578_v62 = vmax.f32 %v564_v55, 0.0  ;;  %v1444_v48 = vpack.c.bf16 %v769_v45, %v761_v44  ;;  %v777_v50 = vld [vmem:[#allocation4 + $0x390] sm:$0xff]  ;;  %v676_v44 = vld [vmem:[#allocation4 + $0x68] sm:$0xff]  ;;  %v670_v45 = vld [vmem:[#allocation4 + $0x38] sm:$0xff] }
 0x1b2   : > { %v569_v58 = vpop.f32.mrb[6].mxu0  ;;  %1347 = vmatprep.subr.bf16.mxu1 %v1346_v54  ;;  %v579_v2 = vmax.f32 %v566_v57, 0.0  ;;  %v1448_v54 = vpack.c.bf16 %v785_v51, %v777_v50  ;;  %v801_v57 = vld [vmem:[#allocation4 + $0x450] sm:$0xff]  ;;  %v678_v47 = vld [vmem:[#allocation4 + $0x78] sm:$0xff]  ;;  %v675_v50 = vld [vmem:[#allocation4 + $0x60] sm:$0xff] }
 0x1b3   : > { %v570_v59 = vadd.f32 %v569_v58, %v470_v56  ;;  %v571_v60 = vpop.f32.mrb[7].mxu0  ;;  %1349 = vmatpush1.bf16.msra.mxu1 %v1348_v53  ;;  %v802_v53 = vld [vmem:[#allocation4 + $0x458] sm:$0xff]  ;;  %v913_v41 = vld [vmem:[#allocation4 + $0x7d0] sm:$0xff] }
 0x1b4   : > { %v572_v61 = vadd.f32 %v571_v60, %v470_v56  ;;  %v1450_v55 = vpack.c.bf16 %v802_v53, %v794_v52  ;;  %v793_v56 = vld [vmem:[#allocation4 + $0x410] sm:$0xff]  ;;  %v810_v58 = vld [vmem:[#allocation4 + $0x498] sm:$0xff] }
 0x1b5   : > { %v580_v63 = vmax.f32 %v570_v59, 0.0  ;;  %v818_v59 = vld [vmem:[#allocation4 + $0x4d8] sm:$0xff]  ;;  %v1452_v60 = vpack.c.bf16 %v801_v57, %v793_v56  ;;  %v669_v51 = vld [vmem:[#allocation4 + $0x30] sm:$0xff]  ;;  %v692_v57 = vld [vmem:[#allocation4 + $0xe8] sm:$0xff] }
 0x1b6   : > { %v581_v3 = vmax.f32 %v572_v61, 0.0  ;;  %v1454_v61 = vpack.c.bf16 %v818_v59, %v810_v58  ;;  %v677_v52 = vld [vmem:[#allocation4 + $0x70] sm:$0xff]  ;;  %v686_v58 = vld [vmem:[#allocation4 + $0xb8] sm:$0xff] }
 0x1b7   : > { %v1352_v4 = vpack.c.bf16 %v580_v63, %v578_v62  ;;  %v809_v62 = vld [vmem:[#allocation4 + $0x490] sm:$0xff]  ;;  %v694_v59 = vld [vmem:[#allocation4 + $0xf8] sm:$0xff] }
 0x1b8   : > { %v1350_v5 = vpack.c.bf16 %v581_v3, %v579_v2  ;;  %v817_v63 = vld [vmem:[#allocation4 + $0x4d0] sm:$0xff]  ;;  %v1458_v3 = vpack.c.bf16 %v834_v1, %v826_v0  ;;  %v691_v0 = vld [vmem:[#allocation4 + $0xe0] sm:$0xff] }
 0x1b9   : > { %v1456_v2 = vpack.c.bf16 %v817_v63, %v809_v62  ;;  %v1548_v62 = vpack.c.bf16 %v677_v52, %v669_v51  ;;  %v683_v63 = vld [vmem:[#allocation4 + $0xa0] sm:$0xff]  ;;  %v749_v52 = vld [vmem:[#allocation4 + $0x2b0] sm:$0xff] }
 0x1ba   : > { %1351 = vmatprep.subr.bf16.mxu1 %v1350_v5  ;;  %v833_v5 = vld [vmem:[#allocation4 + $0x550] sm:$0xff] }
 0x1bb   : > { %1353 = vmatpush1.bf16.msra.mxu1 %v1352_v4  ;;  %v825_v4 = vld [vmem:[#allocation4 + $0x510] sm:$0xff] }
 0x1bc   : > { %1419 = vmatprep.subr.bf16.mxu1 %v1418_v7  ;;  %v842_v7 = vld [vmem:[#allocation4 + $0x598] sm:$0xff]  ;;  %v1460_v9 = vpack.c.bf16 %v833_v5, %v825_v4  ;;  %v700_v4 = vld [vmem:[#allocation4 + $0x128] sm:$0xff] }
 0x1bd   : > { %v1462_v10 = vpack.c.bf16 %v850_v8, %v842_v7  ;;  %v1550_v7 = vpack.c.bf16 %v694_v59, %v686_v58  ;;  %v708_v8 = vld [vmem:[#allocation4 + $0x168] sm:$0xff] }
 0x1be   : > { %1333 = vmatmul.mubr.msk.f32.vlgmr.msra.gmra.mrb[0].mxu1 %vm472_vm0, %v582_v12  ;;  %v849_v12 = vld [vmem:[#allocation4 + $0x5d0] sm:$0xff] }
 0x1bf   : > { %1421 = vmatpush1.bf16.msra.mxu1 %v1420_v13  ;;  %v858_v13 = vld [vmem:[#allocation4 + $0x618] sm:$0xff]  ;;  %v1464_v15 = vpack.c.bf16 %v849_v12, %v841_v11  ;;  %v1488_v11 = vpack.c.bf16 %v691_v0, %v683_v63  ;;  %v765_v0 = vld [vmem:[#allocation4 + $0x330] sm:$0xff] }
 0x1c0   : > { %1423 = vmatprep.subr.bf16.mxu1 %v1422_v14  ;;  %v866_v14 = vld [vmem:[#allocation4 + $0x658] sm:$0xff] }
 0x1c1   : > { %v1466_v16 = vpack.c.bf16 %v866_v14, %v858_v13  ;;  %v699_v13 = vld [vmem:[#allocation4 + $0x120] sm:$0xff] }
 0x1c2   : > { %v707_v14 = vld [vmem:[#allocation4 + $0x160] sm:$0xff] }
 0x1c3   : > { %1425 = vmatpush1.bf16.msra.mxu1 %v1424_v19  ;;  %v874_v19 = vld [vmem:[#allocation4 + $0x698] sm:$0xff]  ;;  %v1492_v22 = vpack.c.bf16 %v707_v14, %v699_v13  ;;  %v781_v14 = vld [vmem:[#allocation4 + $0x3b0] sm:$0xff] }
 0x1c4   : > { %1427 = vmatprep.subr.bf16.mxu1 %v1426_v20  ;;  %v882_v20 = vld [vmem:[#allocation4 + $0x6d8] sm:$0xff] }
 0x1c5   : > { %v1470_v6 = vpack.c.bf16 %v882_v20, %v874_v19  ;;  %v716_v19 = vld [vmem:[#allocation4 + $0x1a8] sm:$0xff] }
 0x1c6   : > { %v724_v20 = vld [vmem:[#allocation4 + $0x1e8] sm:$0xff] }
 0x1c7   : > { %1429 = vmatpush1.bf16.msra.mxu1 %v1428_v24  ;;  %v890_v24 = vld [vmem:[#allocation4 + $0x718] sm:$0xff] }
 0x1c8   : > { %1431 = vmatprep.subr.bf16.mxu1 %v1430_v25  ;;  %v898_v25 = vld [vmem:[#allocation4 + $0x758] sm:$0xff] }
 0x1c9   : > { %v1474_v27 = vpack.c.bf16 %v898_v25, %v890_v24  ;;  %v715_v24 = vld [vmem:[#allocation4 + $0x1a0] sm:$0xff] }
 0x1ca   : > { %v723_v25 = vld [vmem:[#allocation4 + $0x1e0] sm:$0xff] }
 0x1cb   : > { %1433 = vmatpush1.bf16.msra.mxu1 %v1432_v30  ;;  %v1476_v30 = vpack.c.bf16 %v897_v29, %v889_v28  ;;  %v717_v28 = vld [vmem:[#allocation4 + $0x1b0] sm:$0xff] }
 0x1cc   : > { %1435 = vmatprep.subr.bf16.mxu1 %v1434_v31  ;;  %v904_v31 = vld [vmem:[#allocation4 + $0x788] sm:$0xff]  ;;  %v725_v29 = vld [vmem:[#allocation4 + $0x1f0] sm:$0xff] }
 0x1cd   : > { %v1414_v34 = vpack.c.bf16 %v912_v32, %v904_v31  ;;  %v740_v31 = vld [vmem:[#allocation4 + $0x268] sm:$0xff]  ;;  %v734_v32 = vld [vmem:[#allocation4 + $0x238] sm:$0xff]  ;;  %v1560_v35 = vpack.c.bf16 %v725_v29, %v717_v28 }
 0x1ce   : > { %v820_v28 = vld [vmem:[#allocation4 + $0x4e8] sm:$0xff]  ;;  %v814_v29 = vld [vmem:[#allocation4 + $0x4b8] sm:$0xff] }
 0x1cf   : > { %1437 = vmatpush1.bf16.msra.mxu1 %v1436_v36  ;;  %v903_v36 = vld [vmem:[#allocation4 + $0x780] sm:$0xff]  ;;  %1415 = vmatprep.subr.bf16.mxu0 %v1414_v34  ;;  %v1496_v34 = vpack.c.bf16 %v723_v25, %v715_v24  ;;  %v797_v25 = vld [vmem:[#allocation4 + $0x430] sm:$0xff] }
 0x1d0   : > { %1439 = vmatprep.subr.bf16.mxu1 %v1438_v37  ;;  %v911_v37 = vld [vmem:[#allocation4 + $0x7c0] sm:$0xff] }
 0x1d1   : > { %v1416_v39 = vpack.c.bf16 %v911_v37, %v903_v36  ;;  %v731_v36 = vld [vmem:[#allocation4 + $0x220] sm:$0xff] }
 0x1d2   : > { %v739_v37 = vld [vmem:[#allocation4 + $0x260] sm:$0xff] }
 0x1d3   : > { %1441 = vmatpush1.bf16.msra.mxu1 %v1440_v42  ;;  %v1480_v42 = vpack.c.bf16 %v913_v41, %v905_v40  ;;  %1417 = vmatpush1.bf16.msra.mxu0 %v1416_v39  ;;  %v1562_v39 = vpack.c.bf16 %v742_v33, %v734_v32  ;;  %v733_v40 = vld [vmem:[#allocation4 + $0x230] sm:$0xff]  ;;  %v811_v33 = vld [vmem:[#allocation4 + $0x4a0] sm:$0xff] }
 0x1d4   : > { %1443 = vmatprep.subr.bf16.mxu1 %v1442_v43  ;;  %v668_v43 = vld [vmem:[#allocation4 + $0x28] sm:$0xff]  ;;  %v741_v41 = vld [vmem:[#allocation4 + $0x270] sm:$0xff] }
 0x1d5   : > { %v1482_v46 = vpack.c.bf16 %v676_v44, %v668_v43  ;;  %v756_v43 = vld [vmem:[#allocation4 + $0x2e8] sm:$0xff]  ;;  %v750_v44 = vld [vmem:[#allocation4 + $0x2b8] sm:$0xff] }
 0x1d7   : > { %1445 = vmatpush1.bf16.msra.mxu1 %v1444_v48  ;;  %v1546_v48 = vpack.c.bf16 %v678_v47, %v670_v45  ;;  %1483 = vmatprep.subr.bf16.mxu0 %v1482_v46  ;;  %v758_v45 = vld [vmem:[#allocation4 + $0x2f8] sm:$0xff]  ;;  %v1500_v46 = vpack.c.bf16 %v739_v37, %v731_v36  ;;  %v1564_v47 = vpack.c.bf16 %v741_v41, %v733_v40  ;;  %v813_v37 = vld [vmem:[#allocation4 + $0x4b0] sm:$0xff]  ;;  %v836_v40 = vld [vmem:[#allocation4 + $0x568] sm:$0xff] }
 0x1d8   : > { %1447 = vmatprep.subr.bf16.mxu1 %v1446_v49  ;;  %v667_v49 = vld [vmem:[#allocation4 + $0x20] sm:$0xff]  ;;  %v1566_v51 = vpack.c.bf16 %v758_v45, %v750_v44  ;;  %v830_v41 = vld [vmem:[#allocation4 + $0x538] sm:$0xff] }
 0x1d9   : > { %v827_v45 = vld [vmem:[#allocation4 + $0x520] sm:$0xff] }
 0x1db   : > { %1449 = vmatpush1.bf16.msra.mxu1 %v1448_v54  ;;  %v684_v54 = vld [vmem:[#allocation4 + $0xa8] sm:$0xff] }
 0x1dc   : > { %1451 = vmatprep.subr.bf16.mxu1 %v1450_v55  ;;  %v587_v55 = vpop.permute.xlu0 %586  ;;  %v1486_v5 = vpack.c.bf16 %v692_v57, %v684_v54  ;;  %v764_v54 = vld [vmem:[#allocation4 + $0x328] sm:$0xff]  ;;  %v774_v57 = vld [vmem:[#allocation4 + $0x378] sm:$0xff] }
 0x1df   : > { %1453 = vmatpush1.bf16.msra.mxu1 %v1452_v60 }
 0x1e0   : > { %1455 = vmatprep.subr.bf16.mxu1 %v1454_v61  ;;  %v1484_v61 = vpack.c.bf16 %v675_v50, %v667_v49  ;;  %v755_v49 = vld [vmem:[#allocation4 + $0x2e0] sm:$0xff] }
 0x1e3   : > { %1457 = vmatpush1.bf16.msra.mxu1 %v1456_v2  ;;  %v685_v2 = vld [vmem:[#allocation4 + $0xb0] sm:$0xff] }
 0x1e4   : > { %1459 = vmatprep.subr.bf16.mxu1 %v1458_v3  ;;  %v693_v3 = vld [vmem:[#allocation4 + $0xf0] sm:$0xff] }
 0x1e5   : > { %v1552_v12 = vpack.c.bf16 %v693_v3, %v685_v2  ;;  %v773_v2 = vld [vmem:[#allocation4 + $0x370] sm:$0xff]  ;;  %v780_v3 = vld [vmem:[#allocation4 + $0x3a8] sm:$0xff] }
 0x1e7   : > { %1461 = vmatpush1.bf16.msra.mxu1 %v1460_v9  ;;  %v702_v9 = vld [vmem:[#allocation4 + $0x138] sm:$0xff] }
 0x1e8   : > { %1463 = vmatprep.subr.bf16.mxu1 %v1462_v10  ;;  %v710_v10 = vld [vmem:[#allocation4 + $0x178] sm:$0xff] }
 0x1eb   : > { %1465 = vmatpush1.bf16.msra.mxu1 %v1464_v15  ;;  %v1490_v15 = vpack.c.bf16 %v708_v8, %v700_v4  ;;  %v788_v4 = vld [vmem:[#allocation4 + $0x3e8] sm:$0xff] }
 0x1ec   : > { %1467 = vmatprep.subr.bf16.mxu1 %v1466_v16  ;;  %v1554_v16 = vpack.c.bf16 %v710_v10, %v702_v9  ;;  %v1572_v9 = vpack.c.bf16 %v773_v2, %v765_v0  ;;  %v779_v10 = vld [vmem:[#allocation4 + $0x3a0] sm:$0xff]  ;;  %v868_v0 = vld [vmem:[#allocation4 + $0x668] sm:$0xff]  ;;  %v862_v2 = vld [vmem:[#allocation4 + $0x638] sm:$0xff] }
 0x1ef   : > { %1469 = vmatpush1.bf16.msra.mxu1 %v1468_v21  ;;  %v718_v21 = vld [vmem:[#allocation4 + $0x1b8] sm:$0xff] }
 0x1f0   : > { %1471 = vmatprep.subr.bf16.mxu1 %v1470_v6  ;;  %v726_v6 = vld [vmem:[#allocation4 + $0x1f8] sm:$0xff] }
 0x1f3   : > { %1473 = vmatpush1.bf16.msra.mxu1 %v1472_v26  ;;  %v1494_v26 = vpack.c.bf16 %v724_v20, %v716_v19  ;;  %v806_v19 = vld [vmem:[#allocation4 + $0x478] sm:$0xff] }
 0x1f4   : > { %1475 = vmatprep.subr.bf16.mxu1 %v1474_v27  ;;  %v1558_v27 = vpack.c.bf16 %v726_v6, %v718_v21  ;;  %v795_v6 = vld [vmem:[#allocation4 + $0x420] sm:$0xff]  ;;  %v1578_v24 = vpack.c.bf16 %v806_v19, %v798_v18 }
 0x1f5   : > { %v875_v19 = vld [vmem:[#allocation4 + $0x6a0] sm:$0xff] }
 0x1f7   : > { %1477 = vmatpush1.bf16.msra.mxu1 %v1476_v30  ;;  %v732_v30 = vld [vmem:[#allocation4 + $0x228] sm:$0xff] }
 0x1f8   : > { %1479 = vmatprep.subr.bf16.mxu1 %v1478_v38  ;;  %v1498_v38 = vpack.c.bf16 %v740_v31, %v732_v30  ;;  %v822_v30 = vld [vmem:[#allocation4 + $0x4f8] sm:$0xff] }
 0x1f9   : > { %v1582_v36 = vpack.c.bf16 %v822_v30, %v814_v29  ;;  %v891_v30 = vld [vmem:[#allocation4 + $0x720] sm:$0xff] }
 0x1fb   : > { %1481 = vmatpush1.bf16.msra.mxu1 %v1480_v42  ;;  %v748_v42 = vld [vmem:[#allocation4 + $0x2a8] sm:$0xff] }
 0x1fc   : > { %1547 = vmatprep.subr.bf16.mxu1 %v1546_v48  ;;  %v747_v48 = vld [vmem:[#allocation4 + $0x2a0] sm:$0xff]  ;;  %v1502_v50 = vpack.c.bf16 %v756_v43, %v748_v42  ;;  %v838_v42 = vld [vmem:[#allocation4 + $0x578] sm:$0xff] }
 0x1fd   : > { %v1504_v58 = vpack.c.bf16 %v755_v49, %v747_v48  ;;  %v1586_v48 = vpack.c.bf16 %v838_v42, %v830_v41  ;;  %v829_v49 = vld [vmem:[#allocation4 + $0x530] sm:$0xff]  ;;  %v907_v42 = vld [vmem:[#allocation4 + $0x7a0] sm:$0xff] }
 0x291   : > { %v658_v53 = vpop.f32.mrb[0].mxu1 }
 0x292   : > { %v660_v56 = vpop.f32.mrb[1].mxu1  ;;  %v1862_v1 = vadd.f32 %v658_v53, %v587_v55  ;;  %v757_v53 = vld [vmem:[#allocation4 + $0x2f0] sm:$0xff] }
 0x293   : > { %v661_v60 = vadd.f32 %v660_v56, %v587_v55  ;;  %v772_v55 = vld [vmem:[#allocation4 + $0x368] sm:$0xff]  ;;  %v766_v56 = vld [vmem:[#allocation4 + $0x338] sm:$0xff]  ;;  %v1568_v59 = vpack.c.bf16 %v757_v53, %v749_v52 }
 0x294   : > { %v1570_v63 = vpack.c.bf16 %v774_v57, %v766_v56  ;;  %v852_v52 = vld [vmem:[#allocation4 + $0x5e8] sm:$0xff]  ;;  %v846_v53 = vld [vmem:[#allocation4 + $0x5b8] sm:$0xff]  ;;  %v843_v57 = vld [vmem:[#allocation4 + $0x5a0] sm:$0xff] }
 0x295   : > { %983 = vmatprep.mubr.f32.mxu0 %v661_v60  ;;  %1054 = vmatprep.mubr.f32.mxu1 %v661_v60 }
 0x296   : > { %984 = vmatmul.mubr.f32.vlgmr.msra.gmra.mrb[8].mxu0 %v1862_v1  ;;  %1055 = vmatmul.mubr.f32.vlgmr.msra.gmra.mrb[2].mxu1 %v1862_v1 }
 0x297   : > { %1485 = vmatpush1.bf16.msra.mxu0 %v1484_v61  ;;  %1549 = vmatpush1.bf16.msra.mxu1 %v1548_v62  ;;  %v771_v61 = vld [vmem:[#allocation4 + $0x360] sm:$0xff]  ;;  %v1506_v62 = vpack.c.bf16 %v772_v55, %v764_v54  ;;  %v854_v54 = vld [vmem:[#allocation4 + $0x5f8] sm:$0xff] }
 0x298   : > { %1125 = vmatprep.mubr.f32.mxu0 %v661_v60  ;;  %1196 = vmatprep.mubr.f32.mxu1 %v661_v60  ;;  %v763_v60 = vld [vmem:[#allocation4 + $0x320] sm:$0xff] }
 0x299   : > { %1487 = vmatprep.subr.bf16.mxu0 %v1486_v5  ;;  %1551 = vmatprep.subr.bf16.mxu1 %v1550_v7  ;;  %v782_v5 = vld [vmem:[#allocation4 + $0x3b8] sm:$0xff]  ;;  %v1508_v8 = vpack.c.bf16 %v771_v61, %v763_v60  ;;  %v1590_v60 = vpack.c.bf16 %v854_v54, %v846_v53  ;;  %v845_v61 = vld [vmem:[#allocation4 + $0x5b0] sm:$0xff] }
 0x29a   : > { %v790_v7 = vld [vmem:[#allocation4 + $0x3f8] sm:$0xff] }
 0x29b   : > { %1489 = vmatpush1.bf16.msra.mxu0 %v1488_v11  ;;  %1553 = vmatpush1.bf16.msra.mxu1 %v1552_v12  ;;  %v787_v11 = vld [vmem:[#allocation4 + $0x3e0] sm:$0xff]  ;;  %v1510_v12 = vpack.c.bf16 %v788_v4, %v780_v3  ;;  %v1574_v13 = vpack.c.bf16 %v790_v7, %v782_v5  ;;  %v870_v3 = vld [vmem:[#allocation4 + $0x678] sm:$0xff] }
 0x29c   : > { %1491 = vmatprep.subr.bf16.mxu0 %v1490_v15  ;;  %1555 = vmatprep.subr.bf16.mxu1 %v1554_v16  ;;  %v789_v15 = vld [vmem:[#allocation4 + $0x3f0] sm:$0xff]  ;;  %v796_v16 = vld [vmem:[#allocation4 + $0x428] sm:$0xff]  ;;  %v1512_v20 = vpack.c.bf16 %v787_v11, %v779_v10  ;;  %v859_v7 = vld [vmem:[#allocation4 + $0x620] sm:$0xff]  ;;  %v1594_v10 = vpack.c.bf16 %v870_v3, %v862_v2 }
 0x29d   : > { %v1576_v21 = vpack.c.bf16 %v789_v15, %v781_v14  ;;  %v861_v11 = vld [vmem:[#allocation4 + $0x630] sm:$0xff]  ;;  %v884_v14 = vld [vmem:[#allocation4 + $0x6e8] sm:$0xff]  ;;  %v878_v15 = vld [vmem:[#allocation4 + $0x6b8] sm:$0xff] }
 0x29f   : > { %1493 = vmatpush1.bf16.msra.mxu0 %v1492_v22  ;;  %1557 = vmatpush1.bf16.msra.mxu1 %v1556_v23  ;;  %v803_v22 = vld [vmem:[#allocation4 + $0x460] sm:$0xff]  ;;  %v1514_v23 = vpack.c.bf16 %v804_v17, %v796_v16  ;;  %v886_v16 = vld [vmem:[#allocation4 + $0x6f8] sm:$0xff] }
 0x2a0   : > { %1495 = vmatprep.subr.bf16.mxu0 %v1494_v26  ;;  %1559 = vmatprep.subr.bf16.mxu1 %v1558_v27  ;;  %v805_v26 = vld [vmem:[#allocation4 + $0x470] sm:$0xff]  ;;  %v812_v27 = vld [vmem:[#allocation4 + $0x4a8] sm:$0xff]  ;;  %v1516_v31 = vpack.c.bf16 %v803_v22, %v795_v6  ;;  %v1598_v6 = vpack.c.bf16 %v886_v16, %v878_v15 }
 0x2a1   : > { %v1580_v32 = vpack.c.bf16 %v805_v26, %v797_v25  ;;  %v877_v22 = vld [vmem:[#allocation4 + $0x6b0] sm:$0xff]  ;;  %v900_v25 = vld [vmem:[#allocation4 + $0x768] sm:$0xff]  ;;  %v894_v26 = vld [vmem:[#allocation4 + $0x738] sm:$0xff] }
 0x2a3   : > { %1497 = vmatpush1.bf16.msra.mxu0 %v1496_v34  ;;  %1561 = vmatpush1.bf16.msra.mxu1 %v1560_v35  ;;  %v819_v34 = vld [vmem:[#allocation4 + $0x4e0] sm:$0xff]  ;;  %v1518_v35 = vpack.c.bf16 %v820_v28, %v812_v27  ;;  %v902_v27 = vld [vmem:[#allocation4 + $0x778] sm:$0xff] }
 0x2a4   : > { %1499 = vmatprep.subr.bf16.mxu0 %v1498_v38  ;;  %1563 = vmatprep.subr.bf16.mxu1 %v1562_v39  ;;  %v821_v38 = vld [vmem:[#allocation4 + $0x4f0] sm:$0xff]  ;;  %v828_v39 = vld [vmem:[#allocation4 + $0x528] sm:$0xff]  ;;  %v1520_v43 = vpack.c.bf16 %v819_v34, %v811_v33  ;;  %v1602_v33 = vpack.c.bf16 %v902_v27, %v894_v26 }
 0x2a5   : > { %v1584_v44 = vpack.c.bf16 %v821_v38, %v813_v37  ;;  %v893_v34 = vld [vmem:[#allocation4 + $0x730] sm:$0xff]  ;;  %v916_v37 = vld [vmem:[#allocation4 + $0x7e8] sm:$0xff]  ;;  %v910_v38 = vld [vmem:[#allocation4 + $0x7b8] sm:$0xff] }
 0x2a7   : > { %1501 = vmatpush1.bf16.msra.mxu0 %v1500_v46  ;;  %1565 = vmatpush1.bf16.msra.mxu1 %v1564_v47  ;;  %v835_v46 = vld [vmem:[#allocation4 + $0x560] sm:$0xff]  ;;  %v1522_v47 = vpack.c.bf16 %v836_v40, %v828_v39  ;;  %v918_v39 = vld [vmem:[#allocation4 + $0x7f8] sm:$0xff] }
 0x2a8   : > { %1503 = vmatprep.subr.bf16.mxu0 %v1502_v50  ;;  %1567 = vmatprep.subr.bf16.mxu1 %v1566_v51  ;;  %v837_v50 = vld [vmem:[#allocation4 + $0x570] sm:$0xff]  ;;  %v844_v51 = vld [vmem:[#allocation4 + $0x5a8] sm:$0xff]  ;;  %v1524_v55 = vpack.c.bf16 %v835_v46, %v827_v45  ;;  %v915_v45 = vld [vmem:[#allocation4 + $0x7e0] sm:$0xff] }
 0x2a9   : > { %v1588_v56 = vpack.c.bf16 %v837_v50, %v829_v49  ;;  %v909_v46 = vld [vmem:[#allocation4 + $0x7b0] sm:$0xff] }
 0x2ab   : > { %1505 = vmatpush1.bf16.msra.mxu0 %v1504_v58  ;;  %1569 = vmatpush1.bf16.msra.mxu1 %v1568_v59  ;;  %v851_v58 = vld [vmem:[#allocation4 + $0x5e0] sm:$0xff]  ;;  %v1526_v59 = vpack.c.bf16 %v852_v52, %v844_v51 }
 0x2ac   : > { %1507 = vmatprep.subr.bf16.mxu0 %v1506_v62  ;;  %1571 = vmatprep.subr.bf16.mxu1 %v1570_v63  ;;  %v853_v62 = vld [vmem:[#allocation4 + $0x5f0] sm:$0xff]  ;;  %v860_v63 = vld [vmem:[#allocation4 + $0x628] sm:$0xff]  ;;  %v1528_v4 = vpack.c.bf16 %v851_v58, %v843_v57 }
 0x2ad   : > { %v1592_v5 = vpack.c.bf16 %v853_v62, %v845_v61 }
 0x2af   : > { %1509 = vmatpush1.bf16.msra.mxu0 %v1508_v8  ;;  %1573 = vmatpush1.bf16.msra.mxu1 %v1572_v9  ;;  %v867_v8 = vld [vmem:[#allocation4 + $0x660] sm:$0xff]  ;;  %v1530_v9 = vpack.c.bf16 %v868_v0, %v860_v63 }
 0x2b0   : > { %1511 = vmatprep.subr.bf16.mxu0 %v1510_v12  ;;  %1575 = vmatprep.subr.bf16.mxu1 %v1574_v13  ;;  %v869_v12 = vld [vmem:[#allocation4 + $0x670] sm:$0xff]  ;;  %v876_v13 = vld [vmem:[#allocation4 + $0x6a8] sm:$0xff]  ;;  %v1532_v17 = vpack.c.bf16 %v867_v8, %v859_v7 }
 0x2b1   : > { %v1596_v18 = vpack.c.bf16 %v869_v12, %v861_v11 }
 0x2b3   : > { %1513 = vmatpush1.bf16.msra.mxu0 %v1512_v20  ;;  %1577 = vmatpush1.bf16.msra.mxu1 %v1576_v21  ;;  %v883_v20 = vld [vmem:[#allocation4 + $0x6e0] sm:$0xff]  ;;  %v1534_v21 = vpack.c.bf16 %v884_v14, %v876_v13 }
 0x2b4   : > { %1515 = vmatprep.subr.bf16.mxu0 %v1514_v23  ;;  %1579 = vmatprep.subr.bf16.mxu1 %v1578_v24  ;;  %v885_v23 = vld [vmem:[#allocation4 + $0x6f0] sm:$0xff]  ;;  %v892_v24 = vld [vmem:[#allocation4 + $0x728] sm:$0xff]  ;;  %v1536_v28 = vpack.c.bf16 %v883_v20, %v875_v19 }
 0x2b5   : > { %v1600_v29 = vpack.c.bf16 %v885_v23, %v877_v22 }
 0x2b7   : > { %1517 = vmatpush1.bf16.msra.mxu0 %v1516_v31  ;;  %1581 = vmatpush1.bf16.msra.mxu1 %v1580_v32  ;;  %v899_v31 = vld [vmem:[#allocation4 + $0x760] sm:$0xff]  ;;  %v1538_v32 = vpack.c.bf16 %v900_v25, %v892_v24 }
 0x2b8   : > { %1519 = vmatprep.subr.bf16.mxu0 %v1518_v35  ;;  %1583 = vmatprep.subr.bf16.mxu1 %v1582_v36  ;;  %v901_v35 = vld [vmem:[#allocation4 + $0x770] sm:$0xff]  ;;  %v908_v36 = vld [vmem:[#allocation4 + $0x7a8] sm:$0xff]  ;;  %v1540_v40 = vpack.c.bf16 %v899_v31, %v891_v30 }
 0x2b9   : > { %v1604_v41 = vpack.c.bf16 %v901_v35, %v893_v34 }
 0x2bb   : > { %1521 = vmatpush1.bf16.msra.mxu0 %v1520_v43  ;;  %1585 = vmatpush1.bf16.msra.mxu1 %v1584_v44  ;;  %v1542_v43 = vpack.c.bf16 %v916_v37, %v908_v36  ;;  %v1606_v44 = vpack.c.bf16 %v918_v39, %v910_v38 }
 0x2bc   : > { %1523 = vmatprep.subr.bf16.mxu0 %v1522_v47  ;;  %1587 = vmatprep.subr.bf16.mxu1 %v1586_v48  ;;  %v917_v47 = vld [vmem:[#allocation4 + $0x7f0] sm:$0xff]  ;;  %v1544_v48 = vpack.c.bf16 %v915_v45, %v907_v42 }
 0x2bd   : > { %v1608_v49 = vpack.c.bf16 %v917_v47, %v909_v46 }
 0x2bf   : > { %1525 = vmatpush1.bf16.msra.mxu0 %v1524_v55  ;;  %1589 = vmatpush1.bf16.msra.mxu1 %v1588_v56 }
 0x2c0   : > { %1527 = vmatprep.subr.bf16.mxu0 %v1526_v59  ;;  %1591 = vmatprep.subr.bf16.mxu1 %v1590_v60 }
 0x2c3   : > { %1529 = vmatpush1.bf16.msra.mxu0 %v1528_v4  ;;  %1593 = vmatpush1.bf16.msra.mxu1 %v1592_v5 }
 0x2c4   : > { %1531 = vmatprep.subr.bf16.mxu0 %v1530_v9  ;;  %1595 = vmatprep.subr.bf16.mxu1 %v1594_v10 }
 0x2c7   : > { %1533 = vmatpush1.bf16.msra.mxu0 %v1532_v17  ;;  %1597 = vmatpush1.bf16.msra.mxu1 %v1596_v18 }
 0x2c8   : > { %1535 = vmatprep.subr.bf16.mxu0 %v1534_v21  ;;  %1599 = vmatprep.subr.bf16.mxu1 %v1598_v6 }
 0x2cb   : > { %1537 = vmatpush1.bf16.msra.mxu0 %v1536_v28  ;;  %1601 = vmatpush1.bf16.msra.mxu1 %v1600_v29 }
 0x2cc   : > { %1539 = vmatprep.subr.bf16.mxu0 %v1538_v32  ;;  %1603 = vmatprep.subr.bf16.mxu1 %v1602_v33 }
 0x2cf   : > { %1541 = vmatpush1.bf16.msra.mxu0 %v1540_v40  ;;  %1605 = vmatpush1.bf16.msra.mxu1 %v1604_v41 }
 0x2d0   : > { %1543 = vmatprep.subr.bf16.mxu0 %v1542_v43  ;;  %1607 = vmatprep.subr.bf16.mxu1 %v1606_v44 }
 0x2d3   : > { %1545 = vmatpush1.bf16.msra.mxu0 %v1544_v48  ;;  %1609 = vmatpush1.bf16.msra.mxu1 %v1608_v49 }
 0x2d6   : > { %1126 = vmatmul.mubr.f32.vlgmr.msra.gmra.mrb[10].mxu0 %v1862_v1  ;;  %1197 = vmatmul.mubr.f32.vlgmr.msra.gmra.mrb[4].mxu1 %v1862_v1 }
 0x369   : > { %v985_v50 = vpop.f32.mrb[8].mxu0  ;;  %v1056_v51 = vpop.f32.mrb[2].mxu1 }
 0x36a   : > { %v987_v52 = vpop.f32.mrb[9].mxu0  ;;  %v1058_v53 = vpop.f32.mrb[3].mxu1 }
 0x36b   : > { %v1211_v54 = vcombine.low %v985_v50, %v987_v52  ;;  %v1212_v55 = vcombine.low %v1056_v51, %v1058_v53 }
 0x36d   : > { %1219 = vst [vmem:[%s334_s9] sm:$0x77] %v1211_v54  ;;  %1220 = vst [vmem:[%s334_s9 + $0x8] sm:$0x77] %v1212_v55 }
 0x3a9   : > { %v1127_v56 = vpop.f32.mrb[10].mxu0  ;;  %v1198_v57 = vpop.f32.mrb[4].mxu1 }
 0x3aa   : > { %v1129_v58 = vpop.f32.mrb[11].mxu0  ;;  %v1200_v59 = vpop.f32.mrb[5].mxu1 }
 0x3ab   : > { %v1213_v60 = vcombine.low %v1127_v56, %v1129_v58  ;;  %v1214_v61 = vcombine.low %v1198_v57, %v1200_v59 }
 0x3ad   : > { %1221 = vst [vmem:[%s334_s9 + $0x10] sm:$0x77] %v1213_v60  ;;  %1222 = vst [vmem:[%s334_s9 + $0x18] sm:$0x77] %v1214_v61 }
 0x3ae PF: > { %s25_s10 = sadd.s32 1, %s1694_s10  }
 0x3af   : > { %p22_p8 = scmp.ge.s32.totalorder %s25_s10, 4  }
 0x3b1   :  { %24 = sbr.rel (!%p22_p8) target bundleno = 16 (0x10), region = 90 }
 0x3b8   :  { %1244 = vsyncpa [#allocation5], 1 }
 0x3b9   :  { %1246 = vsyncpa [#allocation5 + $0x1], 1 }

</bundles_post_ra>
